<compile_context>
chip_gen: v5e
topology: v5e:2x2
jax: 0.10.0
libtpu: 0.0.40
codegen_flags: <defaults>
</compile_context>

<pallas_src>
import functools

import jax
import jax.numpy as jnp
from jax import lax
from jax.experimental import pallas as pl
from jax.experimental.pallas import tpu as pltpu

_NORM_EPS = 1e-12                      # F.normalize default eps
_NORM_EPS_SQ = _NORM_EPS * _NORM_EPS   # 1e-24, still a normal f32
_TARGET_TILE_BYTES = 2 * 1024 * 1024   # ~2 MiB of activation per buffer
_MAX_TILE_ROWS = 8192


def _round_up(x, m):
    return ((x + m - 1) // m) * m


def _vmem_limits():
    """Generation-aware scoped-VMEM limit + tile budget."""
    try:
        cap = int(pltpu.get_tpu_info().vmem_capacity_bytes)
    except Exception:
        cap = 64 * 1024 * 1024          # v7x-safe fallback (64 MiB physical)
    limit = min(int(cap * 0.75), 100 * 1024 * 1024)   # scoped VMEM we request
    budget = int(limit * 0.85)                        # what tiles may occupy
    return limit, budget


def _pick_row_tile(n_rows, n_cols, in_bytes, out_bytes, resident_bytes, budget):
    """Row tile: byte-targeted, sublane-aligned, fits the VMEM budget."""
    sub = 8 if in_bytes >= 4 else (16 if in_bytes == 2 else 32)
    row_bytes = max(n_cols * in_bytes, 1)
    tr = max(_TARGET_TILE_BYTES // row_bytes, sub)
    tr = _round_up(min(tr, _MAX_TILE_ROWS), sub)
    if tr >= n_rows:
        if n_rows > 2 * sub:
            # Keep >= 2 grid steps so v7x megacore sharding has work.
            tr = _round_up(pl.cdiv(n_rows, 2), sub)
        else:
            tr = n_rows            # exact full-dim block, no partial handling

    def footprint(t):
        # Double-buffered x + out tiles, plus resident params.
        return 2 * t * n_cols * (in_bytes + out_bytes) + resident_bytes

    while tr > sub and footprint(tr) > budget:
        tr = max(_round_up(tr // 2, sub), sub)
    return max(tr, 1)


def _make_kernel(*, use_linear, apply_bn, apply_relu, packed):
    def kernel(*refs):
        idx = 0
        x_ref = refs[idx]; idx += 1
        if use_linear:
            w_ref = refs[idx]; b_ref = refs[idx + 1]; idx += 2
        if apply_bn:
            sc_ref = refs[idx]; sh_ref = refs[idx + 1]; idx += 2
        if packed:
            s_ref = refs[idx]; idx += 1
        o_ref = refs[idx]

        x = x_ref[...]
        in_dtype = x.dtype

        if apply_bn:
            xf = x.astype(jnp.float32) * sc_ref[...] + sh_ref[...]
            if apply_relu:
                xf = jnp.maximum(xf, 0.0)
            # Cast back so bf16 inputs keep the bf16 MXU path.
            x = xf.astype(in_dtype)
        elif apply_relu:
            x = jnp.maximum(x, 0.0)

        # TODO(synk): nn.Dropout is identity in eval mode; training-mode dropout
        # (and training-mode BatchNorm statistics) are not implemented here.

        if use_linear:
            # Weight is already (in_features, out_features) in x's dtype.
            y = lax.dot_general(x, w_ref[...],
                                dimension_numbers=(((1,), (0,)), ((), ())),
                                preferred_element_type=jnp.float32)
            y = y + b_ref[...]
        else:
            y = x.astype(jnp.float32)

        # F.normalize(p=2, dim=-1): multiply by rsqrt of clamped squared norm.
        y2 = y * y
        if packed:
            # Segment-sum over each logical row's D lanes via a resident
            # block-diagonal ones matrix -> result is already broadcast.
            ss = lax.dot_general(y2, s_ref[...],
                                 dimension_numbers=(((1,), (0,)), ((), ())),
                                 preferred_element_type=jnp.float32)
        else:
            ss = jnp.sum(y2, axis=-1, keepdims=True)
        y = y * lax.rsqrt(jnp.maximum(ss, _NORM_EPS_SQ))

        o_ref[...] = y.astype(o_ref.dtype)

    return kernel


def feature_transform(feat, weight, bias, bn_gamma=None, bn_beta=None,
                      bn_mean=None, bn_var=None, *,
                      use_batchnorm=False, use_relu=False, use_linear=True,
                      bn_eps=1e-5):
    """Pallas implementation of FeatureTransform.forward (eval mode).

    feat:   (..., D)  input features (2D or 3D like the PyTorch module)
    weight: (D, D)    nn.Linear weight (out_features, in_features)
    bias:   (D,)      nn.Linear bias
    bn_*:   (D,)      BatchNorm1d parameters / running stats (eval mode)
    """
    orig_shape = feat.shape
    D = orig_shape[-1]
    x2d = feat.reshape(-1, D)
    R = x2d.shape[0]
    compute_dtype = x2d.dtype

    # ---- parameter preparation (one-time, fuses under jit) -----------------
    bn_scale = bn_shift = None
    if use_batchnorm:
        inv_std = 1.0 / jnp.sqrt(bn_var.astype(jnp.float32) + bn_eps)
        bn_scale = bn_gamma.astype(jnp.float32) * inv_std
        bn_shift = bn_beta.astype(jnp.float32) - bn_mean.astype(jnp.float32) * bn_scale

    w_f32 = weight.astype(jnp.float32) if use_linear else None
    b_f32 = bias.astype(jnp.float32) if use_linear else None

    apply_bn_in_kernel = use_batchnorm
    if use_batchnorm and use_linear and not use_relu:
        # Fold eval-mode BN into the linear layer:
        #   (x*s + t) @ W^T + b  ==  x @ (W*s)^T + (W @ t + b)
        b_f32 = b_f32 + w_f32 @ bn_shift
        w_f32 = w_f32 * bn_scale[None, :]
        apply_bn_in_kernel = False

    # Pre-transpose + pre-cast once: kernel sees (in_features, out_features).
    wt = w_f32.T.astype(compute_dtype) if use_linear else None

    # ---- lane-dense packing for small D -------------------------------------
    packed = (D < 128) and (128 % D == 0)
    P = 128 // D if packed else 1
    if packed and (R % P != 0):
        packed = False   # avoid an extra HBM pad/copy of the activations
        P = 1

    if packed:
        N = P * D
        x_in = x2d.reshape(R // P, N)                       # free reshape
        if use_linear:
            w_in = jnp.kron(jnp.eye(P, dtype=wt.dtype), wt)  # block diagonal
            b_in = jnp.tile(b_f32, P).reshape(1, N)
        seg = jnp.arange(N, dtype=jnp.int32) // D
        s_mat = (seg[:, None] == seg[None, :]).astype(jnp.float32)
        if apply_bn_in_kernel:
            scale_in = jnp.tile(bn_scale, P).reshape(1, N)
            shift_in = jnp.tile(bn_shift, P).reshape(1, N)
    else:
        N = D
        x_in = x2d
        if use_linear:
            w_in = wt
            b_in = b_f32.reshape(1, N)
        s_mat = None
        if apply_bn_in_kernel:
            scale_in = bn_scale.reshape(1, N)
            shift_in = bn_shift.reshape(1, N)

    rows = x_in.shape[0]

    # ---- tiling / VMEM sizing ------------------------------------------------
    in_bytes = x_in.dtype.itemsize
    out_bytes = jnp.dtype(feat.dtype).itemsize
    resident = 0
    if use_linear:
        resident += N * N * in_bytes + N * 4
    if apply_bn_in_kernel:
        resident += 2 * N * 4
    if packed:
        resident += N * N * 4

    vmem_limit, vmem_budget = _vmem_limits()
    TR = _pick_row_tile(rows, N, in_bytes, out_bytes, resident, vmem_budget)
    grid = (pl.cdiv(rows, TR),)   # partial last block handled by Pallas; no pad

    # ---- specs / args (conditionally built) ----------------------------------
    args = [x_in]
    in_specs = [pl.BlockSpec((TR, N), lambda i: (i, 0))]
    if use_linear:
        args += [w_in, b_in]
        in_specs += [pl.BlockSpec((N, N), lambda i: (0, 0)),
                     pl.BlockSpec((1, N), lambda i: (0, 0))]
    if apply_bn_in_kernel:
        args += [scale_in, shift_in]
        in_specs += [pl.BlockSpec((1, N), lambda i: (0, 0)),
                     pl.BlockSpec((1, N), lambda i: (0, 0))]
    if packed:
        args += [s_mat]
        in_specs += [pl.BlockSpec((N, N), lambda i: (0, 0))]

    kernel = _make_kernel(use_linear=use_linear,
                          apply_bn=apply_bn_in_kernel,
                          apply_relu=use_relu,
                          packed=packed)

    out = pl.pallas_call(
        kernel,
        out_shape=jax.ShapeDtypeStruct((rows, N), feat.dtype),
        grid_spec=pl.GridSpec(
            grid=grid,
            in_specs=in_specs,
            out_specs=pl.BlockSpec((TR, N), lambda i: (i, 0)),
        ),
        compiler_params=pltpu.CompilerParams(
            dimension_semantics=("parallel",),
            vmem_limit_bytes=int(vmem_limit)),
    )(*args)

    return out.reshape(orig_shape)


def _reference(feat, weight, bias):
    # Pure-JAX reference of the default forward path.
    y = jnp.einsum('...i,oi->...o', feat, weight) + bias
    n = jnp.sqrt(jnp.sum(y * y, axis=-1, keepdims=True))
    return y / jnp.maximum(n, _NORM_EPS)


if __name__ == "__main__":
    B, S, D = 2, 8, 32  # batch, seq, transform_dim
    key = jax.random.PRNGKey(0)
    k_feat, k_w, k_b = jax.random.split(key, 3)

    feat = jax.random.normal(k_feat, (B, S, D), dtype=jnp.float32)

    # Deterministic parameter init mimicking nn.Linear defaults:
    # U(-1/sqrt(in_features), 1/sqrt(in_features)).
    bound = 1.0 / jnp.sqrt(jnp.float32(D))
    weight = jax.random.uniform(k_w, (D, D), minval=-bound, maxval=bound,
                                dtype=jnp.float32)
    bias = jax.random.uniform(k_b, (D,), minval=-bound, maxval=bound,
                              dtype=jnp.float32)

    # BatchNorm1d params / running stats (identity init; unused with defaults).
    bn_gamma = jnp.ones((D,), jnp.float32)
    bn_beta = jnp.zeros((D,), jnp.float32)
    bn_mean = jnp.zeros((D,), jnp.float32)
    bn_var = jnp.ones((D,), jnp.float32)

    run = jax.jit(functools.partial(feature_transform,
                                    use_batchnorm=False, use_relu=False,
                                    use_linear=True))
    out = run(feat, weight, bias, bn_gamma, bn_beta, bn_mean, bn_var)
    out = jax.block_until_ready(out)

    ref = _reference(feat, weight, bias)
    assert out.shape == feat.shape
    assert jnp.allclose(out, ref, atol=1e-5, rtol=1e-5)

    print("KERNEL_OK")
</pallas_src>

<mosaic_0001>
module attributes {stable_mosaic.version = 11 : i64} {
  func.func @kernel(%arg0: i32, %arg1: memref<4x128xf32, #tpu.memory_space<vmem>>, %arg2: memref<128x128xf32, #tpu.memory_space<vmem>>, %arg3: memref<1x128xf32, #tpu.memory_space<vmem>>, %arg4: memref<128x128xf32, #tpu.memory_space<vmem>>, %arg5: memref<4x128xf32, #tpu.memory_space<vmem>>) attributes {dimension_semantics = [#tpu.dimension_semantics<parallel>], iteration_bounds = array<i64: 1>, scalar_prefetch = 0 : i64, scratch_operands = 0 : i64, tpu.core_type = #tpu.core_type<tc>, window_params = [{transform_indices = @transform_0, window_bounds = array<i64: 4, 128>}, {pipeline_mode = #tpu.pipeline_mode<synchronous>, transform_indices = @transform_1, window_bounds = array<i64: 128, 128>}, {pipeline_mode = #tpu.pipeline_mode<synchronous>, transform_indices = @transform_2, window_bounds = array<i64: 1, 128>}, {pipeline_mode = #tpu.pipeline_mode<synchronous>, transform_indices = @transform_3, window_bounds = array<i64: 128, 128>}, {transform_indices = @transform_4, window_bounds = array<i64: 4, 128>}]} {
    %c0 = arith.constant 0 : index
    %c0_0 = arith.constant 0 : index
    %0 = vector.load %arg1[%c0, %c0_0] : memref<4x128xf32, #tpu.memory_space<vmem>>, vector<4x128xf32>
    %c0_1 = arith.constant 0 : index
    %c0_2 = arith.constant 0 : index
    %1 = vector.load %arg2[%c0_1, %c0_2] : memref<128x128xf32, #tpu.memory_space<vmem>>, vector<128x128xf32>
    %cst = arith.constant dense<0.000000e+00> : vector<4x128xf32>
    %2 = tpu.matmul %0, %1, %cst {dimension_numbers = #tpu.dot_dimension_numbers<[1], [0], [0], [1], [0, 0, 1, 1], [], []>} : vector<4x128xf32>, vector<128x128xf32>, vector<4x128xf32> -> vector<4x128xf32>
    %c0_3 = arith.constant 0 : index
    %c0_4 = arith.constant 0 : index
    %3 = vector.load %arg3[%c0_3, %c0_4] : memref<1x128xf32, #tpu.memory_space<vmem>>, vector<1x128xf32>
    %4 = vector.broadcast %3 : vector<1x128xf32> to vector<4x128xf32>
    %5 = arith.addf %2, %4 : vector<4x128xf32>
    %6 = arith.mulf %5, %5 : vector<4x128xf32>
    %c0_5 = arith.constant 0 : index
    %c0_6 = arith.constant 0 : index
    %7 = vector.load %arg4[%c0_5, %c0_6] : memref<128x128xf32, #tpu.memory_space<vmem>>, vector<128x128xf32>
    %cst_7 = arith.constant dense<0.000000e+00> : vector<4x128xf32>
    %8 = tpu.matmul %6, %7, %cst_7 {dimension_numbers = #tpu.dot_dimension_numbers<[1], [0], [0], [1], [0, 0, 1, 1], [], []>} : vector<4x128xf32>, vector<128x128xf32>, vector<4x128xf32> -> vector<4x128xf32>
    %cst_8 = arith.constant 1.000000e-24 : f32
    %9 = vector.broadcast %cst_8 : f32 to vector<4x128xf32>
    %10 = arith.maximumf %8, %9 : vector<4x128xf32>
    %11 = math.rsqrt %10 : vector<4x128xf32>
    %12 = arith.mulf %5, %11 : vector<4x128xf32>
    %c0_9 = arith.constant 0 : index
    %c0_10 = arith.constant 0 : index
    %13 = vector.load %arg5[%c0_9, %c0_10] : memref<4x128xf32, #tpu.memory_space<vmem>>, vector<4x128xf32>
    tpu.vector_store %arg5[%c0_9, %c0_10], %12 {strides = array<i32>} : memref<4x128xf32, #tpu.memory_space<vmem>>, vector<4x128xf32>,
    return
  }
  func.func @transform_0(%arg0: i32) -> (i32, i32) {
    %c0_i32 = arith.constant 0 : i32
    %c0_i32_0 = arith.constant 0 : i32
    return %arg0, %c0_i32 : i32, i32
  }
  func.func @transform_1(%arg0: i32) -> (i32, i32) {
    %c0_i32 = arith.constant 0 : i32
    %c0_i32_0 = arith.constant 0 : i32
    %c0_i32_1 = arith.constant 0 : i32
    return %c0_i32, %c0_i32_0 : i32, i32
  }
  func.func @transform_2(%arg0: i32) -> (i32, i32) {
    %c0_i32 = arith.constant 0 : i32
    %c0_i32_0 = arith.constant 0 : i32
    %c0_i32_1 = arith.constant 0 : i32
    return %c0_i32, %c0_i32_0 : i32, i32
  }
  func.func @transform_3(%arg0: i32) -> (i32, i32) {
    %c0_i32 = arith.constant 0 : i32
    %c0_i32_0 = arith.constant 0 : i32
    %c0_i32_1 = arith.constant 0 : i32
    return %c0_i32, %c0_i32_0 : i32, i32
  }
  func.func @transform_4(%arg0: i32) -> (i32, i32) {
    %c0_i32 = arith.constant 0 : i32
    %c0_i32_0 = arith.constant 0 : i32
    return %arg0, %c0_i32 : i32, i32
  }
}

</mosaic_0001>

<bundles_post_ra>
// kernel: tile.8
= control target key start
LH: loop header
LB: loop body
LE: loop exit
PB: predicated region body
PF: predicated region fallthrough
CT: control target
= control target key end

     0   :  { %s22_s0 = inlined_call_operand.vmem [shape: f32[32], index: 0, kind: input, shape index: {}]   ;;  %s23_s1 = inlined_call_operand.vmem [shape: f32[4,32], index: 1, kind: output, shape index: {}]  }
   0x1   :  { %v4_v0 = vld [vmem:[%s22_s0] ss:$0 sm:$0xff] }
   0x2   :  { %5 = vst [vmem:[%s23_s1] sm:$0xf] %v4_v0 }

// kernel: tile.9
= control target key start
LH: loop header
LB: loop body
LE: loop exit
PB: predicated region body
PF: predicated region fallthrough
CT: control target
= control target key end

     0   :  { %s37_s8 = smov 32   ;;  %s38_s9 = smov 64   ;;  %vm7_vm0 = vcmask 261120   ;;  %vm13_vm1 = vcmask 1048320   ;;  %vm19_vm2 = vcmask 785920   ;;  %vm25_vm3 = vcmask 523520   ;;  %s55_s0 = inlined_call_operand.vmem [shape: f32[4,32], index: 0, kind: input, shape index: {}]   ;;  %s56_s1 = inlined_call_operand.vmem [shape: f32[1,128], index: 1, kind: output, shape index: {}]  }
   0x1   :  { %v4_v0 = vld [vmem:[%s55_s0] sm:$0xf]  ;;  %s36_s0 = smov 96  }
   0x2   :  { %5 = vst [vmem:[#allocation1] sm:$0xf] %v4_v0 }
   0x9   :  { %v10_v1 = vld [vmem:[#allocation1 + $0x3] sm:$0x1]   ;;  %v22_v2 = vld [vmem:[#allocation1 + $0x1] sm:$0x1]   ;;  %v16_v3 = vld [vmem:[#allocation1 + $0x2] sm:$0x1]  }
   0xa   :  { %11 = vrot.lane.b32.xlu0 %v10_v1, %s36_s0  ;;  %23 = vrot.lane.b32.xlu1 %v22_v2, %s37_s8  ;;  %v6_v4 = vld [vmem:[#allocation1] sm:$0x1]  }
   0xb   :  { %8 = vst.msk [vmem:[#allocation0] sm:$0x1] %vm7_vm0, %v6_v4  }
  0x12   :  { %17 = vrot.lane.b32.xlu0 %v16_v3, %s38_s9 }
  0x7c   :  { %v12_v5 = vpop.permute.xlu0 %11   ;;  %v24_v6 = vpop.permute.xlu1 %23  }
  0x7d   :  { %14 = vst.msk [vmem:[#allocation0] sm:$0x1] %vm13_vm1, %v12_v5  }
  0x84   :  { %v18_v7 = vpop.permute.xlu0 %17  }
  0x85   :  { %20 = vst.msk [vmem:[#allocation0] sm:$0x1] %vm19_vm2, %v18_v7  }
  0x86   :  { %26 = vst.msk [vmem:[#allocation0] sm:$0x1] %vm25_vm3, %v24_v6  }
  0x8d   :  { %v29_v8 = vld [vmem:[#allocation0] sm:$0x1] }
  0x8e   :  { %32 = vst [vmem:[%s56_s1] sm:$0x1] %v29_v8 }

// kernel: feature_transform.1
= control target key start
LH: loop header
LB: loop body
LE: loop exit
PB: predicated region body
PF: predicated region fallthrough
CT: control target
= control target key end

     0   :  { %s245_s1 = inlined_call_operand.vmem [shape: f32[128,128], index: 1, kind: input, shape index: {}]   ;;  %s246_s3 = inlined_call_operand.vmem [shape: f32[128,128], index: 3, kind: input, shape index: {}]   ;;  %s247_s2 = inlined_call_operand.vmem [shape: f32[1,128], index: 2, kind: input, shape index: {}]   ;;  %s248_s0 = inlined_call_operand.vmem [shape: f32[4,128], index: 0, kind: input, shape index: {}]   ;;  %s249_s4 = inlined_call_operand.vmem [shape: f32[4,128], index: 4, kind: output, shape index: {}]  }
   0x1   :  { %v33_v0 = vld [vmem:[%s245_s1 + $0x78] sm:$0xff]  ;;  %v32_v1 = vld [vmem:[%s245_s1 + $0x70] sm:$0xff]  ;;  %v31_v2 = vld [vmem:[%s245_s1 + $0x68] sm:$0xff] }
   0x2   :  { %38 = vmatpush.msra.mxu0 %v33_v0  ;;  %v30_v3 = vld [vmem:[%s245_s1 + $0x60] sm:$0xff]  ;;  %v74_v4 = vld [vmem:[%s246_s3 + $0x78] sm:$0xff]  ;;  %v73_v6 = vld [vmem:[%s246_s3 + $0x70] sm:$0xff] }
   0x3   :  { %v29_v5 = vld [vmem:[%s245_s1 + $0x58] sm:$0xff]  ;;  %75 = vmatpush.msra.mxu1 %v74_v4  ;;  %v72_v7 = vld [vmem:[%s246_s3 + $0x68] sm:$0xff]  ;;  %v28_v8 = vld [vmem:[%s245_s1 + $0x50] sm:$0xff] }
   0x4   :  { %39 = vmatpush.msra.mxu0 %v32_v1  ;;  %v71_v9 = vld [vmem:[%s246_s3 + $0x60] sm:$0xff]  ;;  %v27_v10 = vld [vmem:[%s245_s1 + $0x48] sm:$0xff]  ;;  %v70_v11 = vld [vmem:[%s246_s3 + $0x58] sm:$0xff] }
   0x5   :  { %76 = vmatpush.msra.mxu1 %v73_v6  ;;  %v26_v12 = vld [vmem:[%s245_s1 + $0x40] sm:$0xff]  ;;  %v69_v13 = vld [vmem:[%s246_s3 + $0x50] sm:$0xff]  ;;  %v25_v14 = vld [vmem:[%s245_s1 + $0x38] sm:$0xff] }
   0x6   :  { %40 = vmatpush.msra.mxu0 %v31_v2  ;;  %v68_v15 = vld [vmem:[%s246_s3 + $0x48] sm:$0xff]  ;;  %v24_v16 = vld [vmem:[%s245_s1 + $0x30] sm:$0xff]  ;;  %v67_v17 = vld [vmem:[%s246_s3 + $0x40] sm:$0xff] }
   0x7   :  { %77 = vmatpush.msra.mxu1 %v72_v7  ;;  %v23_v18 = vld [vmem:[%s245_s1 + $0x28] sm:$0xff]  ;;  %v66_v19 = vld [vmem:[%s246_s3 + $0x38] sm:$0xff]  ;;  %v22_v20 = vld [vmem:[%s245_s1 + $0x20] sm:$0xff] }
   0x8   :  { %41 = vmatpush.msra.mxu0 %v30_v3  ;;  %v65_v21 = vld [vmem:[%s246_s3 + $0x30] sm:$0xff]  ;;  %v21_v22 = vld [vmem:[%s245_s1 + $0x18] sm:$0xff]  ;;  %v64_v23 = vld [vmem:[%s246_s3 + $0x28] sm:$0xff] }
   0x9   :  { %78 = vmatpush.msra.mxu1 %v71_v9  ;;  %v20_v24 = vld [vmem:[%s245_s1 + $0x10] sm:$0xff]  ;;  %v63_v25 = vld [vmem:[%s246_s3 + $0x20] sm:$0xff]  ;;  %v19_v26 = vld [vmem:[%s245_s1 + $0x8] sm:$0xff] }
   0xa   :  { %42 = vmatpush.msra.mxu0 %v29_v5  ;;  %v62_v27 = vld [vmem:[%s246_s3 + $0x18] sm:$0xff]  ;;  %v18_v28 = vld [vmem:[%s245_s1] sm:$0xff]  ;;  %v61_v30 = vld [vmem:[%s246_s3 + $0x10] sm:$0xff] }
   0xb   :  { %79 = vmatpush.msra.mxu1 %v70_v11  ;;  %v17_v29 = vld [vmem:[%s248_s0] sm:$0xf]  ;;  %v60_v31 = vld [vmem:[%s246_s3 + $0x8] sm:$0xff] }
   0xc   :  { %43 = vmatpush.msra.mxu0 %v28_v8  ;;  %v59_v32 = vld [vmem:[%s246_s3] sm:$0xff] }
   0xd   :  { %80 = vmatpush.msra.mxu1 %v69_v13  ;;  %v112_v33 = vld [vmem:[%s247_s2] ss:$0 sm:$0xff] }
   0xe   :  { %44 = vmatpush.msra.mxu0 %v27_v10 }
   0xf   :  { %81 = vmatpush.msra.mxu1 %v68_v15 }
  0x10   :  { %45 = vmatpush.msra.mxu0 %v26_v12 }
  0x11   :  { %82 = vmatpush.msra.mxu1 %v67_v17 }
  0x12   :  { %46 = vmatpush.msra.mxu0 %v25_v14 }
  0x13   :  { %83 = vmatpush.msra.mxu1 %v66_v19 }
  0x14   :  { %47 = vmatpush.msra.mxu0 %v24_v16 }
  0x15   :  { %84 = vmatpush.msra.mxu1 %v65_v21 }
  0x16   :  { %48 = vmatpush.msra.mxu0 %v23_v18 }
  0x17   :  { %85 = vmatpush.msra.mxu1 %v64_v23 }
  0x18   :  { %49 = vmatpush.msra.mxu0 %v22_v20 }
  0x19   :  { %86 = vmatpush.msra.mxu1 %v63_v25 }
  0x1a   :  { %50 = vmatpush.msra.mxu0 %v21_v22 }
  0x1b   :  { %87 = vmatpush.msra.mxu1 %v62_v27 }
  0x1c   :  { %51 = vmatpush.msra.mxu0 %v20_v24 }
  0x1d   :  { %88 = vmatpush.msra.mxu1 %v61_v30 }
  0x1e   :  { %52 = vmatpush.msra.mxu0 %v19_v26 }
  0x1f   :  { %89 = vmatpush.msra.mxu1 %v60_v31 }
  0x20   :  { %53 = vmatpush.msra.mxu0 %v18_v28 }
  0x21   :  { %54 = vmatmul.f32.vlgmr.msra.gmra.mxu0 %v17_v29  ;;  %90 = vmatpush.msra.mxu1 %v59_v32 }
  0x9e   :  { %v55_v34 = vpop.f32.mrf.mxu0 }
  0x9f   :  { %v56_v35 = vadd.f32 %v112_v33, %v55_v34 }
  0xa1   :  { %v58_v36 = vmul.f32 %v56_v35, %v56_v35 }
  0xa3   :  { %91 = vmatmul.f32.vlgmr.msra.gmra.mxu1 %v58_v36 }
 0x120   :  { %v92_v37 = vpop.f32.mrf.mxu1 }
 0x121   :  { %v95_v38 = vmax.f32 %v92_v37, 1e-24 }
 0x123   :  { %113 = vrsqrt.f32 %v95_v38  ;;  %vm102_vm1 = vweird.f32 %v95_v38 }
 0x129   :  { %v114_v39 = vpop.eup %113 }
 0x12a   :  { %v97_v40 = vmul.f32 %v114_v39, %v95_v38  ;;  %vm103_vm0 = vweird.f32 %v114_v39 }
 0x12b   :  { %vm104_vm2 = vmor %vm102_vm1, %vm103_vm0 }
 0x12c   :  { %v98_v41 = vmul.f32 %v114_v39, %v97_v40 }
 0x12e   :  { %v99_v42 = vmul.f32 0.5, %v98_v41 }
 0x130   :  { %v100_v43 = vsub.f32 1.5, %v99_v42 }
 0x132   :  { %v101_v44 = vmul.f32 %v114_v39, %v100_v43 }
 0x134   :  { %v105_v45 = vsel %vm104_vm2, %v114_v39, %v101_v44 }
 0x135   :  { %v106_v46 = vmul.f32 %v105_v45, %v56_v35 }
 0x137   :  { %107 = vst [vmem:[%s249_s4] sm:$0xf] %v106_v46 }

</bundles_post_ra>
